<compile_context>
chip_gen: v7x
topology: tpu7x:2x2x1
jax: 0.10.0
libtpu: 0.0.40
codegen_flags: <defaults>
</compile_context>

<pallas_src>
import functools
from math import sqrt

import jax
import jax.numpy as jnp
from jax.experimental import pallas as pl
from jax.experimental.pallas import tpu as pltpu

LANE = 128
TB_MAX = 1024   # batch-lane tile cap; grid only splits past this (helps v7x 2-TC)


def _round_up(n, m):
    return ((n + m - 1) // m) * m


def _choose_tiling(batch):
    """Batch is the lane axis, so tiles are multiples of 128.

    Small/medium batches -> a single grid step (one TC does it all; avoids the
    ~0.35us/step pipeline overhead).  Batches > TB_MAX get >=2 'parallel'
    steps so a 2-TC chip (v7x) can split them.
    """
    bl = _round_up(max(batch, 1), LANE)
    if bl <= TB_MAX:
        return bl, bl
    return TB_MAX, _round_up(bl, TB_MAX)


def _mlp_kernel(*refs, n_layers, out_dim):
    # n_layers > 1: (x, w1, wr, b, o)   else: (x, w1, b, o)
    if n_layers > 1:
        x_ref, w1_ref, wr_ref, b_ref, o_ref = refs
    else:
        x_ref, w1_ref, b_ref, o_ref = refs
        wr_ref = None
    # x_ref : (in_dim, TB)          batch in lanes (lane-dense DMA)
    # w1_ref: (PAD, in_dim)         layer-1 weight, PyTorch (out, in), out padded
    # wr_ref: (L-1, PAD, PAD)       layers 2..L stacked (out, in), zero padded
    # b_ref : (PAD, L)              stacked padded biases (column per layer)
    # o_ref : (out_dim, TB)         lane-dense output tile
    b_all = b_ref[...]
    z = jnp.dot(w1_ref[...], x_ref[...], preferred_element_type=jnp.float32)
    z = jnp.maximum(z + b_all[:, 0:1], 0.0)          # ReLU after every layer
    for l in range(1, n_layers):                     # static unroll, L is tiny
        z = jnp.dot(wr_ref[l - 1], z, preferred_element_type=jnp.float32)
        z = jnp.maximum(z + b_all[:, l:l + 1], 0.0)
    o_ref[...] = z[:out_dim, :]                      # lane-dense store


def init_params(key, fc_depth=1, hidden_units=128, input_dim=5, out_dim=1):
    """Deterministic re-implementation of NN.__init__/init_weights.
    PyTorch-native layout: weight (out, in), bias (out,)."""
    if fc_depth <= 1:
        dims = [(input_dim, out_dim)]
    else:
        dims = ([(input_dim, hidden_units)]
                + [(hidden_units, hidden_units)] * (fc_depth - 2)
                + [(hidden_units, out_dim)])
    ws, bs = [], []
    for c_in, c_out in dims:
        key, sub = jax.random.split(key)
        std = (2.0 / sqrt(c_in)) if fc_depth == 1 else (1.0 / sqrt(c_in))
        ws.append(jax.random.normal(sub, (c_out, c_in), dtype=jnp.float32) * std)
        bs.append(jnp.zeros((c_out,), dtype=jnp.float32))
    return ws, bs


def prepare_params(ws, bs):
    """One-time padding/stacking, hoisted out of the per-call hot path."""
    L = len(ws)
    in_dim = ws[0].shape[1]
    out_dim = ws[-1].shape[0]
    feat = [w.shape[0] for w in ws] + [w.shape[1] for w in ws[1:]]
    pad = _round_up(max(feat), LANE)

    w1_p = jnp.zeros((pad, in_dim), jnp.float32).at[:ws[0].shape[0], :].set(ws[0])
    if L > 1:
        wr_p = jnp.zeros((L - 1, pad, pad), jnp.float32)
        for l in range(1, L):
            co, ci = ws[l].shape
            wr_p = wr_p.at[l - 1, :co, :ci].set(ws[l])
    else:
        wr_p = None   # fc_depth == 1: no hidden stack passed to the kernel
    b_p = jnp.zeros((pad, L), jnp.float32)
    for l, b in enumerate(bs):
        b_p = b_p.at[:b.shape[0], l].set(b)
    return {"w1": w1_p, "wr": wr_p, "b": b_p, "n_layers": L, "out_dim": out_dim}


@functools.partial(jax.jit, static_argnames=("n_layers", "out_dim"))
def _forward_impl(x, w1_p, wr_p, b_p, *, n_layers, out_dim):
    B, in_dim = x.shape
    pad = w1_p.shape[0]
    L = n_layers
    tb, bp = _choose_tiling(B)

    # Features-on-sublanes / batch-on-lanes: x -> (in_dim, Bp), zero-pad batch.
    x_t = x.astype(jnp.float32).T
    if bp != B:
        x_in = jnp.zeros((in_dim, bp), jnp.float32).at[:, :B].set(x_t)
    else:
        x_in = x_t

    in_specs = [pl.BlockSpec((in_dim, tb), lambda i: (0, i)),
                # Constant block index => weights stay resident, no re-DMA.
                pl.BlockSpec((pad, in_dim), lambda i: (0, 0))]
    args = [x_in, w1_p]
    if L > 1:
        in_specs.append(pl.BlockSpec((L - 1, pad, pad), lambda i: (0, 0, 0)))
        args.append(wr_p)
    in_specs.append(pl.BlockSpec((pad, L), lambda i: (0, 0)))
    args.append(b_p)

    kernel = functools.partial(_mlp_kernel, n_layers=L, out_dim=out_dim)
    out = pl.pallas_call(
        kernel,
        out_shape=jax.ShapeDtypeStruct((out_dim, bp), jnp.float32),
        grid_spec=pltpu.PrefetchScalarGridSpec(
            num_scalar_prefetch=0,
            grid=(bp // tb,),
            in_specs=in_specs,
            # Lane-dense output block: (out_dim, TB), TB a multiple of 128.
            out_specs=pl.BlockSpec((out_dim, tb), lambda i: (0, i)),
        ),
        compiler_params=pltpu.CompilerParams(
            dimension_semantics=("parallel",)),
    )(*args)
    return out[:, :B].T            # back to (B, out_dim)


def mlp_forward(x, packed):
    return _forward_impl(x, packed["w1"], packed["wr"], packed["b"],
                         n_layers=packed["n_layers"], out_dim=packed["out_dim"])


def reference_forward(x, ws, bs):
    z = x
    for w, b in zip(ws, bs):
        z = jnp.maximum(z @ w.T + b, 0.0)
    return z


if __name__ == "__main__":
    key = jax.random.PRNGKey(0)
    kp, kp1, kx, kx2, kx3 = jax.random.split(key, 5)

    # fc_depth=3, hidden=32: exercises the stacked hidden-layer path.
    ws, bs = init_params(kp, fc_depth=3, hidden_units=32, input_dim=5, out_dim=1)
    packed = prepare_params(ws, bs)

    B = 2
    x = jax.random.normal(kx, (B, 5), dtype=jnp.float32)
    out = jax.block_until_ready(mlp_forward(x, packed))
    ref = reference_forward(x, ws, bs)
    assert out.shape == (B, 1), out.shape
    assert jnp.allclose(out, ref, atol=1e-5, rtol=1e-5), (out, ref)

    # Larger batch (still one grid step: 640 lanes <= TB_MAX).
    B2 = 640
    x2 = jax.random.normal(kx2, (B2, 5), dtype=jnp.float32)
    out2 = jax.block_until_ready(mlp_forward(x2, packed))
    ref2 = reference_forward(x2, ws, bs)
    assert out2.shape == (B2, 1), out2.shape
    assert jnp.allclose(out2, ref2, atol=1e-4, rtol=1e-4), \
        float(jnp.max(jnp.abs(out2 - ref2)))

    # fc_depth=1: single Linear; the hidden-weight stack is not passed at all.
    ws1, bs1 = init_params(kp1, fc_depth=1, input_dim=5, out_dim=1)
    packed1 = prepare_params(ws1, bs1)
    x3 = jax.random.normal(kx3, (3, 5), dtype=jnp.float32)
    out3 = jax.block_until_ready(mlp_forward(x3, packed1))
    ref3 = reference_forward(x3, ws1, bs1)
    assert out3.shape == (3, 1), out3.shape
    assert jnp.allclose(out3, ref3, atol=1e-5, rtol=1e-5), (out3, ref3)

    print("KERNEL_OK")
</pallas_src>

<mosaic_0001>
module attributes {stable_mosaic.version = 11 : i64} {
  func.func @_mlp_kernel(%arg0: i32, %arg1: memref<5x128xf32, #tpu.memory_space<vmem>>, %arg2: memref<128x5xf32, #tpu.memory_space<vmem>>, %arg3: memref<2x128x128xf32, #tpu.memory_space<vmem>>, %arg4: memref<128x3xf32, #tpu.memory_space<vmem>>, %arg5: memref<1x128xf32, #tpu.memory_space<vmem>>) attributes {dimension_semantics = [#tpu.dimension_semantics<parallel>], iteration_bounds = array<i64: 1>, scalar_prefetch = 0 : i64, scratch_operands = 0 : i64, tpu.core_type = #tpu.core_type<tc>, window_params = [{transform_indices = @transform_0, window_bounds = array<i64: 5, 128>}, {pipeline_mode = #tpu.pipeline_mode<synchronous>, transform_indices = @transform_1, window_bounds = array<i64: 128, 5>}, {pipeline_mode = #tpu.pipeline_mode<synchronous>, transform_indices = @transform_2, window_bounds = array<i64: 2, 128, 128>}, {pipeline_mode = #tpu.pipeline_mode<synchronous>, transform_indices = @transform_3, window_bounds = array<i64: 128, 3>}, {transform_indices = @transform_4, window_bounds = array<i64: 1, 128>}]} {
    %c0 = arith.constant 0 : index
    %c0_0 = arith.constant 0 : index
    %0 = vector.load %arg4[%c0, %c0_0] : memref<128x3xf32, #tpu.memory_space<vmem>>, vector<128x3xf32>
    %c0_1 = arith.constant 0 : index
    %c0_2 = arith.constant 0 : index
    %1 = vector.load %arg2[%c0_1, %c0_2] : memref<128x5xf32, #tpu.memory_space<vmem>>, vector<128x5xf32>
    %c0_3 = arith.constant 0 : index
    %c0_4 = arith.constant 0 : index
    %2 = vector.load %arg1[%c0_3, %c0_4] : memref<5x128xf32, #tpu.memory_space<vmem>>, vector<5x128xf32>
    %cst = arith.constant dense<0.000000e+00> : vector<128x128xf32>
    %3 = tpu.matmul %1, %2, %cst {dimension_numbers = #tpu.dot_dimension_numbers<[1], [0], [0], [1], [0, 0, 1, 1], [], []>} : vector<128x5xf32>, vector<5x128xf32>, vector<128x128xf32> -> vector<128x128xf32>
    %4 = vector.extract_strided_slice %0 {offsets = [0, 0], sizes = [128, 1], strides = [1, 1]} : vector<128x3xf32> to vector<128x1xf32>
    %5 = vector.broadcast %4 : vector<128x1xf32> to vector<128x128xf32>
    %6 = arith.addf %3, %5 : vector<128x128xf32>
    %cst_5 = arith.constant 0.000000e+00 : f32
    %7 = vector.broadcast %cst_5 : f32 to vector<128x128xf32>
    %8 = arith.maximumf %6, %7 : vector<128x128xf32>
    %c0_6 = arith.constant 0 : index
    %c0_7 = arith.constant 0 : index
    %c0_8 = arith.constant 0 : index
    %9 = vector.load %arg3[%c0_6, %c0_7, %c0_8] : memref<2x128x128xf32, #tpu.memory_space<vmem>>, vector<1x128x128xf32>
    %10 = vector.shape_cast %9 : vector<1x128x128xf32> to vector<128x128xf32>
    %cst_9 = arith.constant dense<0.000000e+00> : vector<128x128xf32>
    %11 = tpu.matmul %10, %8, %cst_9 {dimension_numbers = #tpu.dot_dimension_numbers<[1], [0], [0], [1], [0, 0, 1, 1], [], []>} : vector<128x128xf32>, vector<128x128xf32>, vector<128x128xf32> -> vector<128x128xf32>
    %12 = vector.extract_strided_slice %0 {offsets = [0, 1], sizes = [128, 1], strides = [1, 1]} : vector<128x3xf32> to vector<128x1xf32>
    %13 = vector.broadcast %12 : vector<128x1xf32> to vector<128x128xf32>
    %14 = arith.addf %11, %13 : vector<128x128xf32>
    %cst_10 = arith.constant 0.000000e+00 : f32
    %15 = vector.broadcast %cst_10 : f32 to vector<128x128xf32>
    %16 = arith.maximumf %14, %15 : vector<128x128xf32>
    %c1 = arith.constant 1 : index
    %c0_11 = arith.constant 0 : index
    %c0_12 = arith.constant 0 : index
    %17 = vector.load %arg3[%c1, %c0_11, %c0_12] : memref<2x128x128xf32, #tpu.memory_space<vmem>>, vector<1x128x128xf32>
    %18 = vector.shape_cast %17 : vector<1x128x128xf32> to vector<128x128xf32>
    %cst_13 = arith.constant dense<0.000000e+00> : vector<128x128xf32>
    %19 = tpu.matmul %18, %16, %cst_13 {dimension_numbers = #tpu.dot_dimension_numbers<[1], [0], [0], [1], [0, 0, 1, 1], [], []>} : vector<128x128xf32>, vector<128x128xf32>, vector<128x128xf32> -> vector<128x128xf32>
    %20 = vector.extract_strided_slice %0 {offsets = [0, 2], sizes = [128, 1], strides = [1, 1]} : vector<128x3xf32> to vector<128x1xf32>
    %21 = vector.broadcast %20 : vector<128x1xf32> to vector<128x128xf32>
    %22 = arith.addf %19, %21 : vector<128x128xf32>
    %cst_14 = arith.constant 0.000000e+00 : f32
    %23 = vector.broadcast %cst_14 : f32 to vector<128x128xf32>
    %24 = arith.maximumf %22, %23 : vector<128x128xf32>
    %25 = vector.extract_strided_slice %24 {offsets = [0, 0], sizes = [1, 128], strides = [1, 1]} : vector<128x128xf32> to vector<1x128xf32>
    %c0_15 = arith.constant 0 : index
    %c0_16 = arith.constant 0 : index
    %26 = vector.load %arg5[%c0_15, %c0_16] : memref<1x128xf32, #tpu.memory_space<vmem>>, vector<1x128xf32>
    tpu.vector_store %arg5[%c0_15, %c0_16], %25 {strides = array<i32>} : memref<1x128xf32, #tpu.memory_space<vmem>>, vector<1x128xf32>,
    return
  }
  func.func @transform_0(%arg0: i32) -> (i32, i32) {
    %c0_i32 = arith.constant 0 : i32
    %c0_i32_0 = arith.constant 0 : i32
    return %c0_i32, %arg0 : i32, i32
  }
  func.func @transform_1(%arg0: i32) -> (i32, i32) {
    %c0_i32 = arith.constant 0 : i32
    %c0_i32_0 = arith.constant 0 : i32
    %c0_i32_1 = arith.constant 0 : i32
    return %c0_i32, %c0_i32_0 : i32, i32
  }
  func.func @transform_2(%arg0: i32) -> (i32, i32, i32) {
    %c0_i32 = arith.constant 0 : i32
    %c0_i32_0 = arith.constant 0 : i32
    %c0_i32_1 = arith.constant 0 : i32
    %c0_i32_2 = arith.constant 0 : i32
    return %c0_i32, %c0_i32_0, %c0_i32_1 : i32, i32, i32
  }
  func.func @transform_3(%arg0: i32) -> (i32, i32) {
    %c0_i32 = arith.constant 0 : i32
    %c0_i32_0 = arith.constant 0 : i32
    %c0_i32_1 = arith.constant 0 : i32
    return %c0_i32, %c0_i32_0 : i32, i32
  }
  func.func @transform_4(%arg0: i32) -> (i32, i32) {
    %c0_i32 = arith.constant 0 : i32
    %c0_i32_0 = arith.constant 0 : i32
    return %c0_i32, %arg0 : i32, i32
  }
}

</mosaic_0001>

<bundles_post_ra>
// kernel: _forward_impl.1
= control target key start
LH: loop header
LB: loop body
LE: loop exit
PB: predicated region body
PF: predicated region fallthrough
CT: control target
= control target key end

     0   :  { %vm179_vm0 = vcmask 1044480   ;;  %vm130_vm1 = vcmask 39936   ;;  %v1112_v3 = vmov 0   ;;  %v1113_v35 = vmov 1   ;;  %s1359_s0 = inlined_call_operand.vmem [shape: f32[5,128], index: 0, kind: input, shape index: {}]   ;;  %s1360_s1 = inlined_call_operand.vmem [shape: f32[128,5], index: 1, kind: input, shape index: {}]   ;;  %s1361_s3 = inlined_call_operand.vmem [shape: f32[128,3], index: 3, kind: input, shape index: {}]   ;;  %s1362_s2 = inlined_call_operand.vmem [shape: f32[2,128,128], index: 2, kind: input, shape index: {}]   ;;  %s1363_s4 = inlined_call_operand.vmem [shape: f32[1,128], index: 4, kind: output, shape index: {}]  }
   0x1   :  { %v49_v0 = vld [vmem:[%s1359_s0] sm:$0x1f]  ;;  %v34_v2 = vld [vmem:[%s1360_s1 + $0x8] sm:$0xff]  ;;  %1106 = vset.pattern.permute.xlu0 %v1112_v3  ;;  %1107 = vset.pattern.permute.xlu1 %v1112_v3  ;;  %v35_v4 = vld [vmem:[%s1360_s1 + $0x10] sm:$0xff] }
   0x2   :  { %v33_v1 = vld [vmem:[%s1360_s1] sm:$0xff]  ;;  %901 = vmatprep.subr.msk.mxu0 %vm179_vm0, %v49_v0  ;;  %v36_v5 = vld [vmem:[%s1360_s1 + $0x18] sm:$0xff]  ;;  %v19_v8 = vld [vmem:[%s1361_s3 + $0x10] sm:$0xff] }
   0x3   :  { %903 = vmatprep.mubr.msk.f32.mxu0 %vm130_vm1, %v33_v1  ;;  %902 = vmatpush3.msk.msra.mxu0 %vm179_vm0, %v49_v0  ;;  %v37_v6 = vld [vmem:[%s1360_s1 + $0x20] sm:$0xff]  ;;  %v18_v9 = vld [vmem:[%s1361_s3 + $0x8] sm:$0xff]  ;;  %v20_v11 = vld [vmem:[%s1361_s3 + $0x18] sm:$0xff] }
   0x4   :  { %904 = vmatmul.mubr.msk.f32.vlgmr.msra.gmra.mrb[0].mxu0 %vm130_vm1, %v34_v2  ;;  %v1164_v7 = vld [vmem:[%s1361_s3] sm:$0xff]  ;;  %62 = vperm.xlu1 %1107, %v19_v8   ;;  %v38_v10 = vld [vmem:[%s1360_s1 + $0x28] sm:$0xff]  ;;  %v39_v12 = vld [vmem:[%s1360_s1 + $0x30] sm:$0xff] }
   0x5   :  { %906 = vmatprep.mubr.msk.f32.mxu0 %vm130_vm1, %v35_v4  ;;  %52 = vperm.xlu0 %1106, %v1164_v7   ;;  %v21_v13 = vld [vmem:[%s1361_s3 + $0x20] sm:$0xff]  ;;  %v40_v14 = vld [vmem:[%s1360_s1 + $0x38] sm:$0xff]  ;;  %v22_v15 = vld [vmem:[%s1361_s3 + $0x28] sm:$0xff] }
   0x6   :  { %v41_v16 = vld [vmem:[%s1360_s1 + $0x40] sm:$0xff]  ;;  %v23_v17 = vld [vmem:[%s1361_s3 + $0x30] sm:$0xff]  ;;  %v42_v18 = vld [vmem:[%s1360_s1 + $0x48] sm:$0xff] }
   0x7   :  { %v24_v19 = vld [vmem:[%s1361_s3 + $0x38] sm:$0xff]  ;;  %v43_v20 = vld [vmem:[%s1360_s1 + $0x50] sm:$0xff]  ;;  %v25_v21 = vld [vmem:[%s1361_s3 + $0x40] sm:$0xff] }
   0x8   :  { %907 = vmatmul.mubr.msk.f32.gmra.mrb[2].mxu0 %vm130_vm1, %v36_v5  ;;  %67 = vperm.xlu1 %1107, %v20_v11   ;;  %v44_v22 = vld [vmem:[%s1360_s1 + $0x58] sm:$0xff]  ;;  %v26_v23 = vld [vmem:[%s1361_s3 + $0x48] sm:$0xff]  ;;  %v45_v24 = vld [vmem:[%s1360_s1 + $0x60] sm:$0xff] }
   0x9   :  { %909 = vmatprep.mubr.msk.f32.mxu0 %vm130_vm1, %v37_v6  ;;  %57 = vperm.xlu0 %1106, %v18_v9   ;;  %v27_v25 = vld [vmem:[%s1361_s3 + $0x50] sm:$0xff]  ;;  %v46_v26 = vld [vmem:[%s1360_s1 + $0x68] sm:$0xff]  ;;  %v28_v27 = vld [vmem:[%s1361_s3 + $0x58] sm:$0xff] }
   0xa   :  { %v47_v28 = vld [vmem:[%s1360_s1 + $0x70] sm:$0xff]  ;;  %v29_v29 = vld [vmem:[%s1361_s3 + $0x60] sm:$0xff]  ;;  %v48_v30 = vld [vmem:[%s1360_s1 + $0x78] sm:$0xff] }
   0xb   :  { %v30_v31 = vld [vmem:[%s1361_s3 + $0x68] sm:$0xff]  ;;  %v31_v32 = vld [vmem:[%s1361_s3 + $0x70] sm:$0xff]  ;;  %v32_v33 = vld [vmem:[%s1361_s3 + $0x78] sm:$0xff] }
   0xc   :  { %910 = vmatmul.mubr.msk.f32.gmra.mrb[4].mxu0 %vm130_vm1, %v38_v10  ;;  %77 = vperm.xlu1 %1107, %v22_v15   ;;  %v344_v34 = vld [vmem:[%s1362_s2] sm:$0xff] }
   0xd   :  { %912 = vmatprep.mubr.msk.f32.mxu0 %vm130_vm1, %v39_v12  ;;  %72 = vperm.xlu0 %1106, %v21_v13  }
   0xe   :  { %959 = vmatprep.mubr.f32.mxu1 %v344_v34 }
  0x10   :  { %913 = vmatmul.mubr.msk.f32.gmra.mrb[6].mxu0 %vm130_vm1, %v40_v14  ;;  %87 = vperm.xlu1 %1107, %v24_v19  }
  0x11   :  { %915 = vmatprep.mubr.msk.f32.mxu0 %vm130_vm1, %v41_v16  ;;  %82 = vperm.xlu0 %1106, %v23_v17  }
  0x14   :  { %916 = vmatmul.mubr.msk.f32.gmra.mrb[8].mxu0 %vm130_vm1, %v42_v18  ;;  %97 = vperm.xlu1 %1107, %v26_v23  }
  0x15   :  { %918 = vmatprep.mubr.msk.f32.mxu0 %vm130_vm1, %v43_v20  ;;  %92 = vperm.xlu0 %1106, %v25_v21  }
  0x18   :  { %919 = vmatmul.mubr.msk.f32.gmra.mrb[10].mxu0 %vm130_vm1, %v44_v22  ;;  %107 = vperm.xlu1 %1107, %v28_v27  }
  0x19   :  { %921 = vmatprep.mubr.msk.f32.mxu0 %vm130_vm1, %v45_v24  ;;  %102 = vperm.xlu0 %1106, %v27_v25  }
  0x1c   :  { %922 = vmatmul.mubr.msk.f32.gmra.mrb[12].mxu0 %vm130_vm1, %v46_v26  ;;  %117 = vperm.xlu1 %1107, %v30_v31  }
  0x1d   :  { %924 = vmatprep.mubr.msk.f32.mxu0 %vm130_vm1, %v47_v28  ;;  %112 = vperm.xlu0 %1106, %v29_v29  }
  0x20   :  { %925 = vmatmul.mubr.msk.f32.gmra.mrb[14].mxu0 %vm130_vm1, %v48_v30  ;;  %127 = vperm.xlu1 %1107, %v32_v33  }
  0x21   :  { %122 = vperm.xlu0 %1106, %v31_v32  }
  0x24   :  { %1109 = vset.pattern.permute.xlu1 %v1113_v35 }
  0x25   :  { %1108 = vset.pattern.permute.xlu0 %v1113_v35  ;;  %365 = vperm.xlu1 %1109, %v18_v9  }
  0x26   :  { %361 = vperm.xlu0 %1108, %v1164_v7  }
  0x29   :  { %369 = vperm.xlu1 %1109, %v19_v8  }
  0x2a   :  { %373 = vperm.xlu0 %1108, %v20_v11  }
  0x2d   :  { %377 = vperm.xlu1 %1109, %v21_v13  }
  0x2e   :  { %381 = vperm.xlu0 %1108, %v22_v15  }
  0x31   :  { %385 = vperm.xlu1 %1109, %v23_v17  }
  0x32   :  { %389 = vperm.xlu0 %1108, %v24_v19  }
  0x35   :  { %393 = vperm.xlu1 %1109, %v25_v21  }
  0x36   :  { %397 = vperm.xlu0 %1108, %v26_v23  }
  0x39   :  { %401 = vperm.xlu1 %1109, %v27_v25  }
  0x3a   :  { %405 = vperm.xlu0 %1108, %v28_v27  }
  0x3d   :  { %409 = vperm.xlu1 %1109, %v29_v29  }
  0x3e   :  { %413 = vperm.xlu0 %1108, %v30_v31  }
  0x41   :  { %417 = vperm.xlu1 %1109, %v31_v32  }
  0x42   :  { %421 = vperm.xlu0 %1108, %v32_v33  }
  0x83   :  { %v63_v36 = vpop.permute.xlu1 %62 }
  0x84   :  { %v53_v37 = vpop.permute.xlu0 %52 }
  0x87   :  { %v68_v38 = vpop.permute.xlu1 %67 }
  0x88   :  { %v58_v39 = vpop.permute.xlu0 %57 }
  0x8b   :  { %v78_v40 = vpop.permute.xlu1 %77 }
  0x8c   :  { %v73_v41 = vpop.permute.xlu0 %72 }
  0x8f   :  { %v88_v47 = vpop.permute.xlu1 %87 }
  0x90   :  { %v83_v50 = vpop.permute.xlu0 %82 }
  0x93   :  { %v98_v60 = vpop.permute.xlu1 %97 }
  0x94   :  { %v93_v63 = vpop.permute.xlu0 %92 }
  0x97   :  { %v108_v9 = vpop.permute.xlu1 %107 }
  0x98   :  { %v103_v12 = vpop.permute.xlu0 %102 }
  0x9b   :  { %v118_v22 = vpop.permute.xlu1 %117 }
  0x9c   :  { %v113_v25 = vpop.permute.xlu0 %112 }
  0x9f   :  { %v128_v34 = vpop.permute.xlu1 %127 }
  0xd7   :  { %v905_v42 = vpop.f32.mrb[0].mxu0 }
  0xd8   :  { %v255_v43 = vadd.f32 %v905_v42, %v58_v39  ;;  %v249_v44 = vpop.f32.mrb[1].mxu0 }
  0xd9   :  { %v250_v45 = vadd.f32 %v249_v44, %v53_v37  ;;  %v123_v37 = vpop.permute.xlu0 %122 }
  0xda   :  { %v329_v46 = vmax.f32 %v255_v43, 0.0 }
  0xdb   :  { %v328_v48 = vmax.f32 %v250_v45, 0.0  ;;  %v908_v49 = vpop.f32.mrb[2].mxu0  ;;  %v345_v45 = vld [vmem:[%s1362_s2 + $0x8] sm:$0xff] }
  0xdc   :  { %v265_v51 = vadd.f32 %v908_v49, %v68_v38  ;;  %v259_v52 = vpop.f32.mrb[3].mxu0  ;;  %v349_v49 = vld [vmem:[%s1362_s2 + $0x28] sm:$0xff] }
  0xdd   :  { %v260_v53 = vadd.f32 %v259_v52, %v63_v36  ;;  %v1039_v54 = vpack.c.bf16 %v329_v46, %v328_v48  ;;  %v346_v46 = vld [vmem:[%s1362_s2 + $0x10] sm:$0xff]  ;;  %v348_v48 = vld [vmem:[%s1362_s2 + $0x20] sm:$0xff] }
  0xde   :  { %v331_v55 = vmax.f32 %v265_v51, 0.0  ;;  %v351_v51 = vld [vmem:[%s1362_s2 + $0x38] sm:$0xff]  ;;  %v352_v52 = vld [vmem:[%s1362_s2 + $0x40] sm:$0xff] }
  0xdf   :  { %v330_v56 = vmax.f32 %v260_v53, 0.0  ;;  %v911_v57 = vpop.f32.mrb[4].mxu0  ;;  %1040 = vmatprep.subr.bf16.mxu1 %v1039_v54  ;;  %v353_v53 = vld [vmem:[%s1362_s2 + $0x48] sm:$0xff] }
  0xe0   :  { %v275_v58 = vadd.f32 %v911_v57, %v78_v40  ;;  %v269_v59 = vpop.f32.mrb[5].mxu0  ;;  %1042 = vmatpush3.bf16.msra.mxu1 %v1039_v54  ;;  %v354_v54 = vld [vmem:[%s1362_s2 + $0x50] sm:$0xff]  ;;  %v357_v57 = vld [vmem:[%s1362_s2 + $0x68] sm:$0xff] }
  0xe1   :  { %v1043_v61 = vpack.c.bf16 %v331_v55, %v330_v56  ;;  %v270_v62 = vadd.f32 %v269_v59, %v73_v41  ;;  %v355_v55 = vld [vmem:[%s1362_s2 + $0x58] sm:$0xff]  ;;  %v356_v56 = vld [vmem:[%s1362_s2 + $0x60] sm:$0xff] }
  0xe2   :  { %v333_v0 = vmax.f32 %v275_v58, 0.0  ;;  %v358_v58 = vld [vmem:[%s1362_s2 + $0x70] sm:$0xff]  ;;  %v359_v59 = vld [vmem:[%s1362_s2 + $0x78] sm:$0xff] }
  0xe3   :  { %v332_v1 = vmax.f32 %v270_v62, 0.0  ;;  %v914_v2 = vpop.f32.mrb[6].mxu0  ;;  %1044 = vmatprep.subr.bf16.mxu1 %v1043_v61  ;;  %v362_v62 = vpop.permute.xlu0 %361 }
  0xe4   :  { %v285_v3 = vadd.f32 %v914_v2, %v88_v47  ;;  %v279_v4 = vpop.f32.mrb[7].mxu0  ;;  %1046 = vmatpush3.bf16.msra.mxu1 %v1043_v61  ;;  %v347_v47 = vld [vmem:[%s1362_s2 + $0x18] sm:$0xff]  ;;  %v1114_v61 = vmov 2  }
  0xe5   :  { %v1047_v5 = vpack.c.bf16 %v333_v0, %v332_v1  ;;  %v280_v6 = vadd.f32 %v279_v4, %v83_v50  ;;  %v350_v50 = vld [vmem:[%s1362_s2 + $0x30] sm:$0xff]  ;;  %1110 = vset.pattern.permute.xlu1 %v1114_v61  ;;  %1111 = vset.pattern.permute.xlu0 %v1114_v61 }
  0xe6   :  { %v335_v8 = vmax.f32 %v285_v3, 0.0  ;;  %603 = vperm.xlu1 %1110, %v1164_v7  }
  0xe7   :  { %v334_v10 = vmax.f32 %v280_v6, 0.0  ;;  %v917_v11 = vpop.f32.mrb[8].mxu0  ;;  %1048 = vmatprep.subr.bf16.mxu1 %v1047_v5  ;;  %v374_v0 = vpop.permute.xlu0 %373 }
  0xe8   :  { %v295_v13 = vadd.f32 %v917_v11, %v98_v60  ;;  %v289_v14 = vpop.f32.mrb[9].mxu0  ;;  %1050 = vmatpush3.bf16.msra.mxu1 %v1047_v5  ;;  %v804_v60 = vld [vmem:[%s1362_s2 + $0x80] sm:$0xff] }
  0xe9   :  { %v1051_v15 = vpack.c.bf16 %v335_v8, %v334_v10  ;;  %v290_v16 = vadd.f32 %v289_v14, %v93_v63  ;;  %1015 = vmatprep.mubr.f32.mxu0 %v804_v60  ;;  %v366_v63 = vpop.permute.xlu1 %365 }
  0xea   :  { %v337_v17 = vmax.f32 %v295_v13, 0.0 }
  0xeb   :  { %v336_v18 = vmax.f32 %v290_v16, 0.0  ;;  %v920_v19 = vpop.f32.mrb[10].mxu0  ;;  %1052 = vmatprep.subr.bf16.mxu1 %v1051_v15  ;;  %v382_v2 = vpop.permute.xlu0 %381 }
  0xec   :  { %v305_v20 = vadd.f32 %v920_v19, %v108_v9  ;;  %v299_v21 = vpop.f32.mrb[11].mxu0  ;;  %1054 = vmatpush3.bf16.msra.mxu1 %v1051_v15 }
  0xed   :  { %v1055_v23 = vpack.c.bf16 %v337_v17, %v336_v18  ;;  %v300_v24 = vadd.f32 %v299_v21, %v103_v12  ;;  %v370_v1 = vpop.permute.xlu1 %369 }
  0xee   :  { %v339_v26 = vmax.f32 %v305_v20, 0.0 }
  0xef   :  { %v338_v27 = vmax.f32 %v300_v24, 0.0  ;;  %v923_v28 = vpop.f32.mrb[12].mxu0  ;;  %1056 = vmatprep.subr.bf16.mxu1 %v1055_v23  ;;  %v390_v10 = vpop.permute.xlu0 %389 }
  0xf0   :  { %v315_v29 = vadd.f32 %v923_v28, %v118_v22  ;;  %v309_v30 = vpop.f32.mrb[13].mxu0  ;;  %1058 = vmatpush3.bf16.msra.mxu1 %v1055_v23 }
  0xf1   :  { %v1059_v31 = vpack.c.bf16 %v339_v26, %v338_v27  ;;  %v310_v32 = vadd.f32 %v309_v30, %v113_v25  ;;  %v378_v3 = vpop.permute.xlu1 %377 }
  0xf2   :  { %v341_v33 = vmax.f32 %v315_v29, 0.0 }
  0xf3   :  { %v340_v35 = vmax.f32 %v310_v32, 0.0  ;;  %v926_v36 = vpop.f32.mrb[14].mxu0  ;;  %1060 = vmatprep.subr.bf16.mxu1 %v1059_v31  ;;  %v398_v22 = vpop.permute.xlu0 %397 }
  0xf4   :  { %v325_v38 = vadd.f32 %v926_v36, %v128_v34  ;;  %v319_v39 = vpop.f32.mrb[15].mxu0  ;;  %1062 = vmatpush3.bf16.msra.mxu1 %v1059_v31 }
  0xf5   :  { %v1063_v40 = vpack.c.bf16 %v341_v33, %v340_v35  ;;  %v320_v41 = vadd.f32 %v319_v39, %v123_v37  ;;  %v386_v13 = vpop.permute.xlu1 %385 }
  0xf6   :  { %v343_v42 = vmax.f32 %v325_v38, 0.0 }
  0xf7   :  { %v342_v43 = vmax.f32 %v320_v41, 0.0  ;;  %1064 = vmatprep.subr.bf16.mxu1 %v1063_v40  ;;  %v406_v34 = vpop.permute.xlu0 %405 }
  0xf8   :  { %1066 = vmatpush3.bf16.msra.mxu1 %v1063_v40 }
  0xf9   :  { %v1067_v44 = vpack.c.bf16 %v343_v42, %v342_v43  ;;  %v394_v25 = vpop.permute.xlu1 %393 }
  0xfb   :  { %1068 = vmatprep.subr.bf16.mxu1 %v1067_v44 }
  0xfc   :  { %1070 = vmatpush3.bf16.msra.mxu1 %v1067_v44 }
  0xfd   :  { %v402_v37 = vpop.permute.xlu1 %401 }
  0xff   :  { %960 = vmatmul.mubr.f32.vlgmr.msra.gmra.mrb[0].mxu1 %v345_v45 }
 0x100   :  { %962 = vmatprep.mubr.f32.mxu1 %v346_v46 }
 0x103   :  { %963 = vmatmul.mubr.f32.gmra.mrb[2].mxu1 %v347_v47  ;;  %v414_v47 = vpop.permute.xlu0 %413 }
 0x104   :  { %965 = vmatprep.mubr.f32.mxu1 %v348_v48 }
 0x107   :  { %966 = vmatmul.mubr.f32.gmra.mrb[4].mxu1 %v349_v49 }
 0x108   :  { %968 = vmatprep.mubr.f32.mxu1 %v350_v50  ;;  %v410_v50 = vpop.permute.xlu1 %409 }
 0x10b   :  { %969 = vmatmul.mubr.f32.gmra.mrb[6].mxu1 %v351_v51 }
 0x10c   :  { %971 = vmatprep.mubr.f32.mxu1 %v352_v52 }
 0x10f   :  { %972 = vmatmul.mubr.f32.gmra.mrb[8].mxu1 %v353_v53 }
 0x110   :  { %974 = vmatprep.mubr.f32.mxu1 %v354_v54 }
 0x113   :  { %975 = vmatmul.mubr.f32.gmra.mrb[10].mxu1 %v355_v55 }
 0x114   :  { %977 = vmatprep.mubr.f32.mxu1 %v356_v56 }
 0x117   :  { %978 = vmatmul.mubr.f32.gmra.mrb[12].mxu1 %v357_v57 }
 0x118   :  { %980 = vmatprep.mubr.f32.mxu1 %v358_v58 }
 0x11b   :  { %981 = vmatmul.mubr.f32.gmra.mrb[14].mxu1 %v359_v59  ;;  %v422_v59 = vpop.permute.xlu0 %421 }
 0x1d2   :  { %v961_v4 = vpop.f32.mrb[0].mxu1 }
 0x1d3   :  { %v496_v5 = vadd.f32 %v961_v4, %v366_v63  ;;  %v490_v6 = vpop.f32.mrb[1].mxu1 }
 0x1d4   :  { %v491_v8 = vadd.f32 %v490_v6, %v362_v62  ;;  %v418_v62 = vpop.permute.xlu1 %417  ;;  %v805_v6 = vld [vmem:[%s1362_s2 + $0x88] sm:$0xff] }
 0x1d5   :  { %v570_v9 = vmax.f32 %v496_v5, 0.0 }
 0x1d6   :  { %v569_v11 = vmax.f32 %v491_v8, 0.0  ;;  %v964_v12 = vpop.f32.mrb[2].mxu1  ;;  %v806_v8 = vld [vmem:[%s1362_s2 + $0x90] sm:$0xff] }
 0x1d7   :  { %v506_v14 = vadd.f32 %v964_v12, %v374_v0  ;;  %v500_v15 = vpop.f32.mrb[3].mxu1  ;;  %v810_v12 = vld [vmem:[%s1362_s2 + $0xb0] sm:$0xff] }
 0x1d8   :  { %v1071_v16 = vpack.c.bf16 %v570_v9, %v569_v11  ;;  %v501_v17 = vadd.f32 %v500_v15, %v370_v1  ;;  %v807_v9 = vld [vmem:[%s1362_s2 + $0x98] sm:$0xff]  ;;  %v809_v11 = vld [vmem:[%s1362_s2 + $0xa8] sm:$0xff] }
 0x1d9   :  { %v572_v7 = vmax.f32 %v506_v14, 0.0  ;;  %v812_v14 = vld [vmem:[%s1362_s2 + $0xc0] sm:$0xff]  ;;  %v813_v15 = vld [vmem:[%s1362_s2 + $0xc8] sm:$0xff] }
 0x1da   :  { %v571_v18 = vmax.f32 %v501_v17, 0.0  ;;  %v967_v19 = vpop.f32.mrb[4].mxu1  ;;  %1072 = vmatprep.subr.bf16.mxu0 %v1071_v16  ;;  %v815_v17 = vld [vmem:[%s1362_s2 + $0xd8] sm:$0xff] }
 0x1db   :  { %v516_v20 = vadd.f32 %v967_v19, %v382_v2  ;;  %v510_v21 = vpop.f32.mrb[5].mxu1  ;;  %1074 = vmatpush3.bf16.msra.mxu0 %v1071_v16  ;;  %v814_v16 = vld [vmem:[%s1362_s2 + $0xd0] sm:$0xff] }
 0x1dc   :  { %v1075_v23 = vpack.c.bf16 %v572_v7, %v571_v18  ;;  %v511_v24 = vadd.f32 %v510_v21, %v378_v3  ;;  %v816_v7 = vld [vmem:[%s1362_s2 + $0xe0] sm:$0xff]  ;;  %v817_v18 = vld [vmem:[%s1362_s2 + $0xe8] sm:$0xff]  ;;  %v818_v19 = vld [vmem:[%s1362_s2 + $0xf0] sm:$0xff]  ;;  %v604_v21 = vpop.permute.xlu1 %603 }
 0x1dd   :  { %v574_v26 = vmax.f32 %v516_v20, 0.0  ;;  %v819_v20 = vld [vmem:[%s1362_s2 + $0xf8] sm:$0xff] }
 0x1de   :  { %v573_v27 = vmax.f32 %v511_v24, 0.0  ;;  %v970_v28 = vpop.f32.mrb[6].mxu1  ;;  %1076 = vmatprep.subr.bf16.mxu0 %v1075_v23 }
 0x1df   :  { %v526_v29 = vadd.f32 %v970_v28, %v390_v10  ;;  %v520_v30 = vpop.f32.mrb[7].mxu1  ;;  %1078 = vmatpush3.bf16.msra.mxu0 %v1075_v23  ;;  %v808_v10 = vld [vmem:[%s1362_s2 + $0xa0] sm:$0xff] }
 0x1e0   :  { %v1079_v31 = vpack.c.bf16 %v574_v26, %v573_v27  ;;  %v521_v32 = vadd.f32 %v520_v30, %v386_v13  ;;  %v811_v13 = vld [vmem:[%s1362_s2 + $0xb8] sm:$0xff] }
 0x1e1   :  { %v576_v33 = vmax.f32 %v526_v29, 0.0 }
 0x1e2   :  { %v575_v35 = vmax.f32 %v521_v32, 0.0  ;;  %v973_v36 = vpop.f32.mrb[8].mxu1  ;;  %1080 = vmatprep.subr.bf16.mxu0 %v1079_v31 }
 0x1e3   :  { %v536_v38 = vadd.f32 %v973_v36, %v398_v22  ;;  %v530_v39 = vpop.f32.mrb[9].mxu1  ;;  %1082 = vmatpush3.bf16.msra.mxu0 %v1079_v31 }
 0x1e4   :  { %v1083_v40 = vpack.c.bf16 %v576_v33, %v575_v35  ;;  %v531_v41 = vadd.f32 %v530_v39, %v394_v25 }
 0x1e5   :  { %v578_v42 = vmax.f32 %v536_v38, 0.0 }
 0x1e6   :  { %v577_v43 = vmax.f32 %v531_v41, 0.0  ;;  %v976_v44 = vpop.f32.mrb[10].mxu1  ;;  %1084 = vmatprep.subr.bf16.mxu0 %v1083_v40 }
 0x1e7   :  { %v546_v45 = vadd.f32 %v976_v44, %v406_v34  ;;  %v540_v46 = vpop.f32.mrb[11].mxu1  ;;  %1086 = vmatpush3.bf16.msra.mxu0 %v1083_v40 }
 0x1e8   :  { %v1087_v48 = vpack.c.bf16 %v578_v42, %v577_v43  ;;  %v541_v49 = vadd.f32 %v540_v46, %v402_v37 }
 0x1e9   :  { %v580_v51 = vmax.f32 %v546_v45, 0.0 }
 0x1ea   :  { %v579_v52 = vmax.f32 %v541_v49, 0.0  ;;  %v979_v53 = vpop.f32.mrb[12].mxu1  ;;  %1088 = vmatprep.subr.bf16.mxu0 %v1087_v48 }
 0x1eb   :  { %v556_v54 = vadd.f32 %v979_v53, %v414_v47  ;;  %v550_v55 = vpop.f32.mrb[13].mxu1  ;;  %1090 = vmatpush3.bf16.msra.mxu0 %v1087_v48 }
 0x1ec   :  { %v1091_v56 = vpack.c.bf16 %v580_v51, %v579_v52  ;;  %v551_v57 = vadd.f32 %v550_v55, %v410_v50 }
 0x1ed   :  { %v582_v58 = vmax.f32 %v556_v54, 0.0 }
 0x1ee   :  { %v581_v60 = vmax.f32 %v551_v57, 0.0  ;;  %v982_v61 = vpop.f32.mrb[14].mxu1  ;;  %1092 = vmatprep.subr.bf16.mxu0 %v1091_v56 }
 0x1ef   :  { %v566_v63 = vadd.f32 %v982_v61, %v422_v59  ;;  %v560_v0 = vpop.f32.mrb[15].mxu1  ;;  %1094 = vmatpush3.bf16.msra.mxu0 %v1091_v56 }
 0x1f0   :  { %v1095_v1 = vpack.c.bf16 %v582_v58, %v581_v60  ;;  %v561_v2 = vadd.f32 %v560_v0, %v418_v62 }
 0x1f1   :  { %v584_v3 = vmax.f32 %v566_v63, 0.0 }
 0x1f2   :  { %v583_v4 = vmax.f32 %v561_v2, 0.0  ;;  %1096 = vmatprep.subr.bf16.mxu0 %v1095_v1 }
 0x1f3   :  { %1098 = vmatpush3.bf16.msra.mxu0 %v1095_v1 }
 0x1f4   :  { %v1099_v5 = vpack.c.bf16 %v584_v3, %v583_v4 }
 0x1f6   :  { %1100 = vmatprep.subr.bf16.mxu0 %v1099_v5 }
 0x1f7   :  { %1102 = vmatpush3.bf16.msra.mxu0 %v1099_v5 }
 0x1fa   :  { %1016 = vmatmul.mubr.f32.vlgmr.msra.gmra.mrb[16].mxu0 %v805_v6 }
 0x1fb   :  { %1018 = vmatprep.mubr.f32.mxu0 %v806_v8 }
 0x1fe   :  { %1019 = vmatmul.mubr.f32.gmra.mrb[18].mxu0 %v807_v9 }
 0x1ff   :  { %1021 = vmatprep.mubr.f32.mxu0 %v808_v10 }
 0x202   :  { %1022 = vmatmul.mubr.f32.gmra.mrb[20].mxu0 %v809_v11 }
 0x203   :  { %1024 = vmatprep.mubr.f32.mxu0 %v810_v12 }
 0x206   :  { %1025 = vmatmul.mubr.f32.gmra.mrb[22].mxu0 %v811_v13 }
 0x207   :  { %1027 = vmatprep.mubr.f32.mxu0 %v812_v14 }
 0x20a   :  { %1028 = vmatmul.mubr.f32.gmra.mrb[24].mxu0 %v813_v15 }
 0x20b   :  { %1030 = vmatprep.mubr.f32.mxu0 %v814_v16 }
 0x20e   :  { %1031 = vmatmul.mubr.f32.gmra.mrb[26].mxu0 %v815_v17 }
 0x20f   :  { %1033 = vmatprep.mubr.f32.mxu0 %v816_v7 }
 0x212   :  { %1034 = vmatmul.mubr.f32.gmra.mrb[28].mxu0 %v817_v18 }
 0x213   :  { %1036 = vmatprep.mubr.f32.mxu0 %v818_v19 }
 0x216   :  { %1037 = vmatmul.mubr.f32.gmra.mrb[30].mxu0 %v819_v20 }
 0x2cd   :  { %v1017_v22 = vpop.f32.mrb[16].mxu0 }
 0x2ce   :  { %v717_v23 = vpop.f32.mrb[17].mxu0 }
 0x2cf   :  { %v718_v24 = vadd.f32 %v717_v23, %v604_v21 }
 0x2d1   :  { %v781_v25 = vmax.f32 %v718_v24, 0.0  ;;  %v1020_v26 = vpop.f32.mrb[18].mxu0 }
 0x2d2   :  { %v726_v27 = vpop.f32.mrb[19].mxu0 }
 0x2d3   :  { %782 = vst [vmem:[%s1363_s4] sm:$0x1] %v781_v25 }
 0x2d5   :  { %v1023_v28 = vpop.f32.mrb[20].mxu0 }
 0x2d6   :  { %v734_v29 = vpop.f32.mrb[21].mxu0 }
 0x2d9   :  { %v1026_v30 = vpop.f32.mrb[22].mxu0 }
 0x2da   :  { %v742_v31 = vpop.f32.mrb[23].mxu0 }
 0x2dd   :  { %v1029_v32 = vpop.f32.mrb[24].mxu0 }
 0x2de   :  { %v750_v33 = vpop.f32.mrb[25].mxu0 }
 0x2e1   :  { %v1032_v34 = vpop.f32.mrb[26].mxu0 }
 0x2e2   :  { %v758_v35 = vpop.f32.mrb[27].mxu0 }
 0x2e5   :  { %v1035_v36 = vpop.f32.mrb[28].mxu0 }
 0x2e6   :  { %v766_v37 = vpop.f32.mrb[29].mxu0 }
 0x2e9   :  { %v1038_v38 = vpop.f32.mrb[30].mxu0 }
 0x2ea   :  { %v774_v39 = vpop.f32.mrb[31].mxu0 }

</bundles_post_ra>
